<compile_context>
chip_gen: v5e
topology: v5e:2x2
jax: 0.10.0
libtpu: 0.0.40
codegen_flags: <defaults>
</compile_context>

<pallas_src>
import functools
import math

import jax
import jax.numpy as jnp
from jax import lax
from jax.experimental import pallas as pl
from jax.experimental.pallas import tpu as pltpu

_MASK_FILL = -10000.0   # matches PyTorch masked_fill value
_FLASH_MIN_L = 1024     # auto-switch to the online-softmax path above this length


# ----------------------------------------------------------------------------
# Hardware-derived sizing
# ----------------------------------------------------------------------------
@functools.lru_cache(maxsize=1)
def _vmem_limit_bytes():
    """Scoped-VMEM limit derived from the physical VMEM of the local chip."""
    phys = None
    try:
        phys = int(pltpu.get_tpu_info().vmem_capacity_bytes)
    except Exception:
        phys = None
    if not phys or phys <= 0:
        phys = 64 * 1024 * 1024          # conservative: v7x has the smallest VMEM
    # ~75% of physical: 48 MiB on v7x (64 MiB), 96 MiB cap on v5e/v6e (128 MiB).
    return min((phys * 3) // 4, 96 * 1024 * 1024)


@functools.lru_cache(maxsize=1)
def _num_tensorcores():
    """2 on megacore / dual-TC chips (v4, v5p, v7x), else 1 (v5e, v6e)."""
    try:
        kind = jax.devices()[0].device_kind.lower()
    except Exception:
        return 1
    return 2 if any(t in kind for t in ("v4", "v5p", "v7", "7x")) else 1


# ----------------------------------------------------------------------------
# Kernels
# ----------------------------------------------------------------------------
def _attention_body(q, k, v, mask, o_ref, s_ref):
    """Whole-key-range attention: q (G,Lq,D), k/v (G,Lk,D), optional int8 mask."""
    d = q.shape[-1]
    # Fold 1/sqrt(d) into q: Lq*D multiplies instead of Lq*Lk on the score matrix.
    qs = q * jnp.asarray(1.0 / math.sqrt(d), q.dtype)
    score = jnp.einsum("gqd,gkd->gqk", qs, k, preferred_element_type=jnp.float32)
    if mask is not None:
        score = jnp.where(mask == 0, jnp.float32(_MASK_FILL), score)
    m = jnp.max(score, axis=-1, keepdims=True)
    ex = jnp.exp(score - m)
    denom = jnp.sum(ex, axis=-1, keepdims=True)
    if s_ref is not None:
        # Exact reciprocal so returned probabilities sum to 1 per row; cast the
        # Lq*Lk tile ONCE and reuse it for the score store and the PV matmul.
        p = (ex * pl.reciprocal(denom, approx=False)).astype(v.dtype)
        s_ref[...] = p.astype(s_ref.dtype)
        o_ref[...] = jnp.einsum("gqk,gkd->gqd", p, v,
                                preferred_element_type=jnp.float32).astype(o_ref.dtype)
    else:
        # No score output: defer normalization to after the PV matmul so the
        # elementwise multiply is Lq*D instead of Lq*Lk; EUP approx reciprocal.
        o = jnp.einsum("gqk,gkd->gqd", ex.astype(v.dtype), v,
                       preferred_element_type=jnp.float32)
        o_ref[...] = (o * pl.reciprocal(denom, approx=True)).astype(o_ref.dtype)


def _sdpa_kernel(q_ref, k_ref, v_ref, o_ref, s_ref):
    _attention_body(q_ref[...], k_ref[...], v_ref[...], None, o_ref, s_ref)


def _sdpa_kernel_masked(q_ref, k_ref, v_ref, m_ref, o_ref, s_ref):
    _attention_body(q_ref[...], k_ref[...], v_ref[...], m_ref[...], o_ref, s_ref)


def _sdpa_kernel_noscore(q_ref, k_ref, v_ref, o_ref):
    _attention_body(q_ref[...], k_ref[...], v_ref[...], None, o_ref, None)


def _sdpa_kernel_masked_noscore(q_ref, k_ref, v_ref, m_ref, o_ref):
    _attention_body(q_ref[...], k_ref[...], v_ref[...], m_ref[...], o_ref, None)


_KERNELS = {
    # (has_mask, return_score) -> kernel
    (False, True): _sdpa_kernel,
    (True, True): _sdpa_kernel_masked,
    (False, False): _sdpa_kernel_noscore,
    (True, False): _sdpa_kernel_masked_noscore,
}


def _make_flash_kernel(has_mask, tk, lk_valid):
    """KV-tiled online-softmax kernel (no score output).

    lk_valid: real key length if the key axis was padded, else None (no pad-mask
    code is emitted at all in that case).
    """
    def kernel(*refs):
        if has_mask:
            q_ref, k_ref, v_ref, m_ref, o_ref, m_sc, l_sc, acc_sc = refs
        else:
            q_ref, k_ref, v_ref, o_ref, m_sc, l_sc, acc_sc = refs
            m_ref = None
        j = pl.program_id(2)

        @pl.when(j == 0)
        def _():
            m_sc[...] = jnp.full_like(m_sc, -jnp.inf)
            l_sc[...] = jnp.zeros_like(l_sc)
            acc_sc[...] = jnp.zeros_like(acc_sc)

        d = q_ref.shape[-1]
        q = q_ref[...] * jnp.asarray(1.0 / math.sqrt(d), q_ref.dtype)
        s = jnp.einsum("gqd,gkd->gqk", q, k_ref[...],
                       preferred_element_type=jnp.float32)
        if m_ref is not None:
            s = jnp.where(m_ref[...] == 0, jnp.float32(_MASK_FILL), s)
        if lk_valid is not None:
            # Padded key columns contribute exactly zero probability.
            col = j * tk + lax.broadcasted_iota(jnp.int32, s.shape, 2)
            s = jnp.where(col < lk_valid, s, jnp.float32(-jnp.inf))

        m_prev = m_sc[...]
        m_new = jnp.maximum(m_prev, jnp.max(s, axis=-1, keepdims=True))
        alpha = jnp.exp(m_prev - m_new)
        p = jnp.exp(s - m_new)
        l_sc[...] = alpha * l_sc[...] + jnp.sum(p, axis=-1, keepdims=True)
        acc_sc[...] = alpha * acc_sc[...] + jnp.einsum(
            "gqk,gkd->gqd", p.astype(v_ref.dtype), v_ref[...],
            preferred_element_type=jnp.float32)
        m_sc[...] = m_new

        @pl.when(j == pl.num_programs(2) - 1)
        def _():
            o_ref[...] = (acc_sc[...] *
                          pl.reciprocal(l_sc[...], approx=True)).astype(o_ref.dtype)

    return kernel


# ----------------------------------------------------------------------------
# Wrapper helpers
# ----------------------------------------------------------------------------
def _normalize_mask(mask, B, H, L):
    """Return (mask_flat int8, mode) with mode in {"per_head", "batch", "shared"}."""
    mask = jnp.asarray(mask)
    if mask.ndim < 4:
        mask = mask.reshape((1,) * (4 - mask.ndim) + mask.shape)
    Bm, Hm = mask.shape[0], mask.shape[1]
    mask = jnp.broadcast_to(mask, (Bm, Hm, L, L))
    mask_i8 = (mask != 0).astype(jnp.int8)            # 1 = keep, 0 = mask out
    if Hm == 1 and Bm == 1:
        return mask_i8.reshape(1, L, L), "shared"
    if Hm == 1 and Bm == B:
        return mask_i8.reshape(B, L, L), "batch"
    mask_i8 = jnp.broadcast_to(mask_i8, (B, H, L, L)).reshape(B * H, L, L)
    return mask_i8, "per_head"


def _largest_divisor(n, cap):
    cap = int(max(1, min(n, cap)))
    for c in range(cap, 0, -1):
        if n % c == 0:
            return c
    return 1


def _pad_axis(x, axis, size):
    pad = size - x.shape[axis]
    if pad <= 0:
        return x
    widths = [(0, 0)] * x.ndim
    widths[axis] = (0, pad)
    return jnp.pad(x, widths)


def _pick_q_tile(L, D, isize, has_mask, return_score, budget):
    """Largest query tile whose per-step working set fits the VMEM budget."""
    def fits(tq):
        b = 4 * L * D * isize                 # K, V full-length blocks (double buffered)
        b += 4 * tq * D * isize               # q, out blocks (double buffered)
        if return_score:
            b += 2 * tq * L * isize           # score output block
        if has_mask:
            b += 2 * tq * L                   # int8 mask block
        b += 3 * tq * L * 4                   # f32 score / exp intermediates
        return b <= budget
    cands = [c for c in (512, 256, 128, 64, 32) if c <= max(32, L) and fits(c)]
    if not cands:
        cands = [32]
    for c in cands:                           # prefer a divisor of L (no padding)
        if L % c == 0:
            return c
    return cands[0]


def _pick_flash_tiles(L, D, isize, has_mask, budget):
    """(tq, tk) for the online-softmax path; per-step working set fits the budget."""
    def fits(tq, tk):
        b = 4 * (tq + tk) * D * isize         # q/out + k/v blocks (double buffered)
        if has_mask:
            b += 2 * tq * tk                  # int8 mask block
        b += 3 * tq * tk * 4                  # f32 score / exp intermediates
        b += tq * (D + 2) * 4                 # m/l/acc f32 scratch
        return b <= budget
    tk_cands = [c for c in (512, 256, 128) if c <= max(128, L) and fits(256, c)]
    if not tk_cands:
        tk_cands = [128]
    tk = next((c for c in tk_cands if L % c == 0), tk_cands[0])
    tq_cands = [c for c in (512, 256, 128, 64, 32) if c <= max(32, L) and fits(c, tk)]
    if not tq_cands:
        tq_cands = [32]
    tq = next((c for c in tq_cands if L % c == 0), tq_cands[0])
    return tq, tk


# ----------------------------------------------------------------------------
# Public entry point
# ----------------------------------------------------------------------------
def scale_dot_product_attention(q, k, v, mask=None, e=1e-12, *,
                                return_score=True, impl=None):
    """Pallas-TPU equivalent of ScaleDotProductAttention.forward.

    q, k, v : [batch, head, length, d_tensor] (float32 or bfloat16)
    mask    : optional, broadcastable to [batch, head, length, length]; 0 = mask out
    e       : unused (kept for API parity with the PyTorch module)
    return_score : if False, the L*L post-softmax matrix is never written to HBM
                   (strongly recommended for long sequences); None is returned.
    impl    : None (auto) | "packed" | "qtiled" | "flash"
    returns : (out [B,H,L,D], score [B,H,L,L] in the input dtype, or None)
    """
    del e                                     # unused, kept for signature parity
    return_score = bool(return_score)
    B, H, L, D = k.shape
    BH = B * H
    dtype = q.dtype
    isize = jnp.dtype(dtype).itemsize
    has_mask = mask is not None

    vmem_limit = _vmem_limit_bytes()
    budget = (vmem_limit * 3) // 5            # per-step working-set budget

    q_bh = q.reshape(BH, L, D)
    k_bh = k.reshape(BH, L, D)
    v_bh = v.reshape(BH, L, D)

    if has_mask:
        mask_flat, mask_mode = _normalize_mask(mask, B, H, L)
    else:
        mask_flat, mask_mode = None, None

    # Whole-L working set per head (I/O blocks double buffered, f32 intermediates not).
    per_head_bytes = (8 * L * D * isize
                      + (2 * L * L * isize if return_score else 0)
                      + (2 * L * L if has_mask else 0)
                      + 3 * L * L * 4)

    if impl is None:
        if not return_score and L >= _FLASH_MIN_L:
            impl = "flash"
        elif per_head_bytes <= budget:
            impl = "packed"
        elif not return_score:
            impl = "flash"
        else:
            impl = "qtiled"
    if impl not in ("packed", "qtiled", "flash"):
        raise ValueError(f"unknown impl: {impl!r}")
    if impl == "flash" and return_score:
        raise ValueError("impl='flash' does not materialize the score matrix; "
                         "use return_score=False or impl='qtiled'/'packed'.")

    # ------------------------------------------------------------------ packed
    if impl == "packed":
        cap = max(1, budget // max(1, per_head_bytes))
        if _num_tensorcores() >= 2 and BH >= 2:
            cap = min(cap, BH // 2)           # keep >= 2 grid steps only on dual-TC chips
        if mask_mode == "batch":
            G = _largest_divisor(H, cap)      # a group must not cross a batch boundary
        else:
            G = _largest_divisor(BH, cap)
        grid = (BH // G,)
        qkv_spec = pl.BlockSpec((G, L, D), lambda g: (g, 0, 0))
        o_spec = pl.BlockSpec((G, L, D), lambda g: (g, 0, 0))
        s_spec = pl.BlockSpec((G, L, L), lambda g: (g, 0, 0))
        if mask_mode == "per_head":
            m_spec = pl.BlockSpec((G, L, L), lambda g: (g, 0, 0))
        elif mask_mode == "batch":
            hpg = H // G
            m_spec = pl.BlockSpec((1, L, L), lambda g: (g // hpg, 0, 0))
        elif mask_mode == "shared":
            m_spec = pl.BlockSpec((1, L, L), lambda g: (0, 0, 0))
        else:
            m_spec = None

        in_specs = [qkv_spec, qkv_spec, qkv_spec]
        args = [q_bh, k_bh, v_bh]
        if has_mask:
            in_specs.append(m_spec)
            args.append(mask_flat)
        out_shape = [jax.ShapeDtypeStruct((BH, L, D), dtype)]
        out_specs = [o_spec]
        if return_score:
            out_shape.append(jax.ShapeDtypeStruct((BH, L, L), dtype))
            out_specs.append(s_spec)

        results = pl.pallas_call(
            _KERNELS[(has_mask, return_score)],
            out_shape=tuple(out_shape),
            grid=grid, in_specs=in_specs, out_specs=tuple(out_specs),
            compiler_params=pltpu.CompilerParams(
                dimension_semantics=("parallel",),
                vmem_limit_bytes=vmem_limit),
        )(*args)
        out = results[0].reshape(B, H, L, D)
        score = results[1].reshape(B, H, L, L) if return_score else None
        return out, score

    # ------------------------------------------------------------------ qtiled
    if impl == "qtiled":
        tq = _pick_q_tile(L, D, isize, has_mask, return_score, budget)
        lq_pad = -(-L // tq) * tq
        nq = lq_pad // tq
        q_in = _pad_axis(q_bh, 1, lq_pad)
        m_in = _pad_axis(mask_flat, 1, lq_pad) if has_mask else None

        q_spec = pl.BlockSpec((1, tq, D), lambda b, i: (b, i, 0))
        kv_spec = pl.BlockSpec((1, L, D), lambda b, i: (b, 0, 0))
        o_spec = pl.BlockSpec((1, tq, D), lambda b, i: (b, i, 0))
        s_spec = pl.BlockSpec((1, tq, L), lambda b, i: (b, i, 0))
        if mask_mode == "per_head":
            m_spec = pl.BlockSpec((1, tq, L), lambda b, i: (b, i, 0))
        elif mask_mode == "batch":
            m_spec = pl.BlockSpec((1, tq, L), lambda b, i: (b // H, i, 0))
        elif mask_mode == "shared":
            m_spec = pl.BlockSpec((1, tq, L), lambda b, i: (0, i, 0))
        else:
            m_spec = None

        in_specs = [q_spec, kv_spec, kv_spec]
        args = [q_in, k_bh, v_bh]
        if has_mask:
            in_specs.append(m_spec)
            args.append(m_in)
        out_shape = [jax.ShapeDtypeStruct((BH, lq_pad, D), dtype)]
        out_specs = [o_spec]
        if return_score:
            out_shape.append(jax.ShapeDtypeStruct((BH, lq_pad, L), dtype))
            out_specs.append(s_spec)

        # q-tile axis "arbitrary": v7x megacore sharding splits BH, never the q-tile
        # axis of one head (would duplicate the resident full-L K/V across cores).
        results = pl.pallas_call(
            _KERNELS[(has_mask, return_score)],
            out_shape=tuple(out_shape),
            grid=(BH, nq), in_specs=in_specs, out_specs=tuple(out_specs),
            compiler_params=pltpu.CompilerParams(
                dimension_semantics=("parallel", "arbitrary"),
                vmem_limit_bytes=vmem_limit),
        )(*args)
        out = results[0][:, :L].reshape(B, H, L, D)
        score = results[1][:, :L].reshape(B, H, L, L) if return_score else None
        return out, score

    # ------------------------------------------------------------------- flash
    tq, tk = _pick_flash_tiles(L, D, isize, has_mask, budget)
    lq_pad = -(-L // tq) * tq
    lk_pad = -(-L // tk) * tk
    nq, nk = lq_pad // tq, lk_pad // tk
    q_in = _pad_axis(q_bh, 1, lq_pad)
    k_in = _pad_axis(k_bh, 1, lk_pad)
    v_in = _pad_axis(v_bh, 1, lk_pad)
    m_in = (_pad_axis(_pad_axis(mask_flat, 1, lq_pad), 2, lk_pad)
            if has_mask else None)

    q_spec = pl.BlockSpec((1, tq, D), lambda b, i, j: (b, i, 0))
    kv_spec = pl.BlockSpec((1, tk, D), lambda b, i, j: (b, j, 0))
    o_spec = pl.BlockSpec((1, tq, D), lambda b, i, j: (b, i, 0))
    if mask_mode == "per_head":
        m_spec = pl.BlockSpec((1, tq, tk), lambda b, i, j: (b, i, j))
    elif mask_mode == "batch":
        m_spec = pl.BlockSpec((1, tq, tk), lambda b, i, j: (b // H, i, j))
    elif mask_mode == "shared":
        m_spec = pl.BlockSpec((1, tq, tk), lambda b, i, j: (0, i, j))
    else:
        m_spec = None

    in_specs = [q_spec, kv_spec, kv_spec]
    args = [q_in, k_in, v_in]
    if has_mask:
        in_specs.append(m_spec)
        args.append(m_in)

    kernel = _make_flash_kernel(has_mask, tk, L if lk_pad != L else None)
    # TODO(synk): structured (e.g. causal) masks could be generated in-kernel from
    # broadcasted_iota instead of DMA-ing an int8 L*L mask; kept explicit for parity.
    out = pl.pallas_call(
        kernel,
        out_shape=jax.ShapeDtypeStruct((BH, lq_pad, D), dtype),
        grid=(BH, nq, nk),
        in_specs=in_specs,
        out_specs=o_spec,
        scratch_shapes=[pltpu.VMEM((1, tq, 1), jnp.float32),
                        pltpu.VMEM((1, tq, 1), jnp.float32),
                        pltpu.VMEM((1, tq, D), jnp.float32)],
        compiler_params=pltpu.CompilerParams(
            dimension_semantics=("parallel", "parallel", "arbitrary"),
            vmem_limit_bytes=vmem_limit),
    )(*args)
    out = out[:, :L].reshape(B, H, L, D)
    return out, None


# ----------------------------------------------------------------------------
# Pure-JAX reference (mirrors the PyTorch forward) and self-test
# ----------------------------------------------------------------------------
def _reference(q, k, v, mask=None):
    d = k.shape[-1]
    score = jnp.einsum("bhld,bhmd->bhlm",
                       q.astype(jnp.float32), k.astype(jnp.float32)) / math.sqrt(d)
    if mask is not None:
        score = jnp.where(mask == 0, -10000.0, score)
    score = jax.nn.softmax(score, axis=-1)
    out = jnp.einsum("bhlm,bhmd->bhld", score, v.astype(jnp.float32))
    return out, score


if __name__ == "__main__":
    key = jax.random.PRNGKey(0)
    TOL = dict(atol=2e-2, rtol=2e-2)
    TOL_BF16 = dict(atol=6e-2, rtol=6e-2)

    # ---- Small shapes: packed whole-L path, float32 ----
    B, H, L, D = 2, 4, 8, 32
    kq, kk, kv, km = jax.random.split(key, 4)
    q = jax.random.normal(kq, (B, H, L, D), dtype=jnp.float32)
    k = jax.random.normal(kk, (B, H, L, D), dtype=jnp.float32)
    v = jax.random.normal(kv, (B, H, L, D), dtype=jnp.float32)
    mask_bcast = (jax.random.uniform(km, (B, 1, L, L)) > 0.2).astype(jnp.int32)

    out0, score0 = scale_dot_product_attention(q, k, v)
    jax.block_until_ready((out0, score0))
    r_out0, r_score0 = _reference(q, k, v)
    assert jnp.allclose(out0, r_out0, **TOL)
    assert jnp.allclose(score0, r_score0, **TOL)

    out1, score1 = scale_dot_product_attention(q, k, v, mask=mask_bcast)
    jax.block_until_ready((out1, score1))
    r_out1, r_score1 = _reference(q, k, v, mask_bcast)
    assert jnp.allclose(out1, r_out1, **TOL)
    assert jnp.allclose(score1, r_score1, **TOL)

    # ---- Query-tiled path (scores requested), causal mask, bfloat16 ----
    B2, H2, L2, D2 = 1, 2, 128, 64
    k2s = jax.random.split(jax.random.PRNGKey(1), 3)
    q2 = jax.random.normal(k2s[0], (B2, H2, L2, D2), dtype=jnp.bfloat16)
    k2 = jax.random.normal(k2s[1], (B2, H2, L2, D2), dtype=jnp.bfloat16)
    v2 = jax.random.normal(k2s[2], (B2, H2, L2, D2), dtype=jnp.bfloat16)
    causal2 = jnp.tril(jnp.ones((L2, L2), dtype=jnp.int32))[None, None]
    out2, score2 = scale_dot_product_attention(q2, k2, v2, mask=causal2, impl="qtiled")
    jax.block_until_ready((out2, score2))
    r_out2, r_score2 = _reference(q2, k2, v2, causal2)
    assert jnp.allclose(out2.astype(jnp.float32), r_out2, **TOL_BF16)
    assert jnp.allclose(score2.astype(jnp.float32), r_score2, **TOL_BF16)

    # ---- Flash (online-softmax) path: masked, no score writeback ----
    B3, H3, L3, D3 = 1, 2, 256, 64
    k3s = jax.random.split(jax.random.PRNGKey(2), 3)
    q3 = jax.random.normal(k3s[0], (B3, H3, L3, D3), dtype=jnp.float32)
    k3 = jax.random.normal(k3s[1], (B3, H3, L3, D3), dtype=jnp.float32)
    v3 = jax.random.normal(k3s[2], (B3, H3, L3, D3), dtype=jnp.float32)
    causal3 = jnp.tril(jnp.ones((L3, L3), dtype=jnp.int32))[None, None]
    out3, score3 = scale_dot_product_attention(q3, k3, v3, mask=causal3,
                                               return_score=False, impl="flash")
    jax.block_until_ready(out3)
    assert score3 is None
    r_out3, _ = _reference(q3, k3, v3, causal3)
    assert jnp.allclose(out3, r_out3, **TOL)

    # ---- Flash path, awkward length (query/key padding + iota pad-masking) ----
    L4 = 200
    q4 = jax.random.normal(k3s[0], (B3, H3, L4, D3), dtype=jnp.float32)
    k4 = jax.random.normal(k3s[1], (B3, H3, L4, D3), dtype=jnp.float32)
    v4 = jax.random.normal(k3s[2], (B3, H3, L4, D3), dtype=jnp.float32)
    out4, _ = scale_dot_product_attention(q4, k4, v4, return_score=False, impl="flash")
    jax.block_until_ready(out4)
    r_out4, _ = _reference(q4, k4, v4)
    assert jnp.allclose(out4, r_out4, **TOL)

    print("KERNEL_OK")
</pallas_src>

<mosaic_0001>
module attributes {stable_mosaic.version = 11 : i64} {
  func.func @_sdpa_kernel(%arg0: i32, %arg1: memref<8x8x32xf32, #tpu.memory_space<vmem>>, %arg2: memref<8x8x32xf32, #tpu.memory_space<vmem>>, %arg3: memref<8x8x32xf32, #tpu.memory_space<vmem>>, %arg4: memref<8x8x32xf32, #tpu.memory_space<vmem>>, %arg5: memref<8x8x8xf32, #tpu.memory_space<vmem>>) attributes {dimension_semantics = [#tpu.dimension_semantics<parallel>], iteration_bounds = array<i64: 1>, scalar_prefetch = 0 : i64, scratch_operands = 0 : i64, tpu.core_type = #tpu.core_type<tc>, window_params = [{transform_indices = @transform_0, window_bounds = array<i64: 8, 8, 32>}, {transform_indices = @transform_1, window_bounds = array<i64: 8, 8, 32>}, {transform_indices = @transform_2, window_bounds = array<i64: 8, 8, 32>}, {transform_indices = @transform_3, window_bounds = array<i64: 8, 8, 32>}, {transform_indices = @transform_4, window_bounds = array<i64: 8, 8, 8>}]} {
    %c0 = arith.constant 0 : index
    %c0_0 = arith.constant 0 : index
    %c0_1 = arith.constant 0 : index
    %0 = vector.load %arg1[%c0, %c0_0, %c0_1] : memref<8x8x32xf32, #tpu.memory_space<vmem>>, vector<8x8x32xf32>
    %c0_2 = arith.constant 0 : index
    %c0_3 = arith.constant 0 : index
    %c0_4 = arith.constant 0 : index
    %1 = vector.load %arg2[%c0_2, %c0_3, %c0_4] : memref<8x8x32xf32, #tpu.memory_space<vmem>>, vector<8x8x32xf32>
    %c0_5 = arith.constant 0 : index
    %c0_6 = arith.constant 0 : index
    %c0_7 = arith.constant 0 : index
    %2 = vector.load %arg3[%c0_5, %c0_6, %c0_7] : memref<8x8x32xf32, #tpu.memory_space<vmem>>, vector<8x8x32xf32>
    %cst = arith.constant 0.176776692 : f32
    %3 = vector.broadcast %cst : f32 to vector<8x8x32xf32>
    %4 = arith.mulf %0, %3 : vector<8x8x32xf32>
    "tpu.trace_start"() <{level = 10 : i32, message = "gqd,gkd->gqk"}> : () -> ()
    %cst_8 = arith.constant dense<0.000000e+00> : vector<8x8x8xf32>
    %5 = tpu.matmul %4, %1, %cst_8 {dimension_numbers = #tpu.dot_dimension_numbers<[2], [2], [1], [1], [0, 0, 0, 1, 1, 1], [0], [0]>} : vector<8x8x32xf32>, vector<8x8x32xf32>, vector<8x8x8xf32> -> vector<8x8x8xf32>
    "tpu.trace_stop"() : () -> ()
    %cst_9 = arith.constant dense<0xFF800000> : vector<8x8xf32>
    %6 = vector.multi_reduction <maximumf>, %5, %cst_9 [2] : vector<8x8x8xf32> to vector<8x8xf32>
    %7 = vector.shape_cast %6 : vector<8x8xf32> to vector<8x8x1xf32>
    %8 = vector.broadcast %7 : vector<8x8x1xf32> to vector<8x8x8xf32>
    %9 = arith.subf %5, %8 : vector<8x8x8xf32>
    %10 = math.exp %9 : vector<8x8x8xf32>
    %cst_10 = arith.constant dense<0.000000e+00> : vector<8x8xf32>
    %11 = vector.multi_reduction <add>, %10, %cst_10 [2] : vector<8x8x8xf32> to vector<8x8xf32>
    %12 = vector.shape_cast %11 : vector<8x8xf32> to vector<8x8x1xf32>
    %13 = tpu.reciprocal %12 : vector<8x8x1xf32> -> vector<8x8x1xf32>
    %14 = vector.broadcast %13 : vector<8x8x1xf32> to vector<8x8x8xf32>
    %15 = arith.mulf %10, %14 : vector<8x8x8xf32>
    %c0_11 = arith.constant 0 : index
    %c0_12 = arith.constant 0 : index
    %c0_13 = arith.constant 0 : index
    %16 = vector.load %arg5[%c0_11, %c0_12, %c0_13] : memref<8x8x8xf32, #tpu.memory_space<vmem>>, vector<8x8x8xf32>
    tpu.vector_store %arg5[%c0_11, %c0_12, %c0_13], %15 {strides = array<i32>} : memref<8x8x8xf32, #tpu.memory_space<vmem>>, vector<8x8x8xf32>,
    "tpu.trace_start"() <{level = 10 : i32, message = "gqk,gkd->gqd"}> : () -> ()
    %cst_14 = arith.constant dense<0.000000e+00> : vector<8x8x32xf32>
    %17 = tpu.matmul %15, %2, %cst_14 {dimension_numbers = #tpu.dot_dimension_numbers<[2], [1], [1], [2], [0, 0, 0, 1, 1, 2], [0], [0]>} : vector<8x8x8xf32>, vector<8x8x32xf32>, vector<8x8x32xf32> -> vector<8x8x32xf32>
    "tpu.trace_stop"() : () -> ()
    %c0_15 = arith.constant 0 : index
    %c0_16 = arith.constant 0 : index
    %c0_17 = arith.constant 0 : index
    %18 = vector.load %arg4[%c0_15, %c0_16, %c0_17] : memref<8x8x32xf32, #tpu.memory_space<vmem>>, vector<8x8x32xf32>
    tpu.vector_store %arg4[%c0_15, %c0_16, %c0_17], %17 {strides = array<i32>} : memref<8x8x32xf32, #tpu.memory_space<vmem>>, vector<8x8x32xf32>,
    return
  }
  func.func @transform_0(%arg0: i32) -> (i32, i32, i32) {
    %c0_i32 = arith.constant 0 : i32
    %c0_i32_0 = arith.constant 0 : i32
    %c0_i32_1 = arith.constant 0 : i32
    return %arg0, %c0_i32, %c0_i32_0 : i32, i32, i32
  }
  func.func @transform_1(%arg0: i32) -> (i32, i32, i32) {
    %c0_i32 = arith.constant 0 : i32
    %c0_i32_0 = arith.constant 0 : i32
    %c0_i32_1 = arith.constant 0 : i32
    return %arg0, %c0_i32, %c0_i32_0 : i32, i32, i32
  }
  func.func @transform_2(%arg0: i32) -> (i32, i32, i32) {
    %c0_i32 = arith.constant 0 : i32
    %c0_i32_0 = arith.constant 0 : i32
    %c0_i32_1 = arith.constant 0 : i32
    return %arg0, %c0_i32, %c0_i32_0 : i32, i32, i32
  }
  func.func @transform_3(%arg0: i32) -> (i32, i32, i32) {
    %c0_i32 = arith.constant 0 : i32
    %c0_i32_0 = arith.constant 0 : i32
    %c0_i32_1 = arith.constant 0 : i32
    return %arg0, %c0_i32, %c0_i32_0 : i32, i32, i32
  }
  func.func @transform_4(%arg0: i32) -> (i32, i32, i32) {
    %c0_i32 = arith.constant 0 : i32
    %c0_i32_0 = arith.constant 0 : i32
    %c0_i32_1 = arith.constant 0 : i32
    return %arg0, %c0_i32, %c0_i32_0 : i32, i32, i32
  }
}

</mosaic_0001>

<bundles_post_ra>
// kernel: tpu_custom_call.1
= control target key start
LH: loop header
LB: loop body
LE: loop exit
PB: predicated region body
PF: predicated region fallthrough
CT: control target
= control target key end

     0   :  { %10 = vsyncpa [#allocation3], 0  ;;  %s1137_s0 = inlined_call_operand.hbm [shape: f32[8,8,32], index: 0, kind: input, shape index: {}]   ;;  %s1138_s1 = inlined_call_operand.hbm [shape: f32[8,8,32], index: 1, kind: input, shape index: {}]   ;;  %s1139_s2 = inlined_call_operand.hbm [shape: f32[8,8,32], index: 2, kind: input, shape index: {}]   ;;  %s1140_s3 = inlined_call_operand.hbm [shape: f32[8,8,32], index: 3, kind: output, shape index: {0}]   ;;  %s1141_s4 = inlined_call_operand.hbm [shape: f32[8,8,8], index: 4, kind: output, shape index: {1}]  }
   0x1   :  { %11 = vsyncpa [#allocation6], 0 }
   0x2   :  { %12 = vsyncpa [#allocation4], 0 }
   0x3   :  { %13 = vsyncpa [#allocation10], 0  ;;  %s31_s17 = sshll.u32 %s1138_s1, 4  ;;  %s928_s18 = smov [#allocation5]   ;;  %s32_s17 = int_to_ptr.hbm [resolvable:$true] %s31_s17 }
   0x4   :  { %s33_s19 = sshll.u32 %s928_s18, 4  ;;  %s18_s22 = sshll.u32 %s1137_s0, 4  ;;  %s34_s19 = int_to_ptr.vmem [resolvable:$true] %s33_s19  ;;  %s19_s22 = int_to_ptr.hbm [resolvable:$true] %s18_s22 }
   0x5   :  { %s929_s23 = smov 128   ;;  %s930_s24 = smov 8  }
   0x6   :  { %39 = dma.hbm_to_vmem [thread:$0]  %s32_s17, 1024, %s34_s19, [#allocation6], %s929_s23, %s929_s23, %s930_s24  }
   0x7   :  { %s931_s25 = smov [#allocation2]   ;;  %s44_s1 = sshll.u32 %s1139_s2, 4  ;;  %s45_s1 = int_to_ptr.hbm [resolvable:$true] %s44_s1 }
   0x8   :  { %s20_s26 = sshll.u32 %s931_s25, 4  ;;  %s932_s0 = smov [#allocation7]   ;;  %s21_s26 = int_to_ptr.vmem [resolvable:$true] %s20_s26 }
   0x9   :  { %26 = dma.hbm_to_vmem [thread:$0]  %s19_s22, 1024, %s21_s26, [#allocation3], %s929_s23, %s929_s23, %s930_s24  }
   0xa   :  { %s46_s29 = sshll.u32 %s932_s0, 4  ;;  %s47_s29 = int_to_ptr.vmem [resolvable:$true] %s46_s29 }
   0xb   :  { %52 = dma.hbm_to_vmem [thread:$0]  %s45_s1, 1024, %s47_s29, [#allocation6], %s929_s23, %s929_s23, %s930_s24  }
   0xc   :  { %920 = dma.done.wait [#allocation3], 1024  }
   0xd   :  { %921 = vsyncadd [#allocation3], 4294966272 }
   0xe   :  { %922 = dma.done.wait [#allocation6], 2048  }
   0xf   :  { %923 = vsyncadd [#allocation6], 4294965248  ;;  %vm97_vm0 = vcmask 261120   ;;  %v73_v0 = vld [vmem:[#allocation5] sm:$0xff]  ;;  %v75_v1 = vld [vmem:[#allocation5 + $0x10] sm:$0xff]  ;;  %vm306_vm1 = vcmask 64512  }
  0x10   :  { %v65_v2 = vld [vmem:[#allocation2] sm:$0xff]  ;;  %737 = vmatpush.xpose.msk.msra.mxu0 %vm97_vm0, %v73_v0  ;;  %741 = vmatpush.xpose.msk.msra.mxu2 %vm97_vm0, %v75_v1  ;;  %v67_v4 = vld [vmem:[#allocation2 + $0x10] sm:$0xff]  ;;  %v74_v6 = vld [vmem:[#allocation5 + $0x8] sm:$0xff]  ;;  %s933_s2 = smov [#allocation9]   ;;  %s718_s7 = sshll.u32 %s1141_s4, 4  ;;  %s719_s7 = int_to_ptr.hbm [resolvable:$true] %s718_s7 }
  0x11   :  { %v89_v3 = vmul.f32 0.17677669, %v65_v2  ;;  %v79_v5 = vld [vmem:[#allocation5 + $0x30] sm:$0xff]  ;;  %v91_v7 = vmul.f32 0.17677669, %v67_v4  ;;  %739 = vmatpush.xpose.msk.msra.mxu1 %vm97_vm0, %v74_v6  ;;  %v76_v8 = vld [vmem:[#allocation5 + $0x18] sm:$0xff] }
  0x12   :  { %v66_v9 = vld [vmem:[#allocation2 + $0x8] sm:$0xff]  ;;  %v68_v10 = vld [vmem:[#allocation2 + $0x18] sm:$0xff]  ;;  %743 = vmatpush.xpose.msk.msra.mxu3 %vm97_vm0, %v76_v8  ;;  %v71_v15 = vld [vmem:[#allocation2 + $0x30] sm:$0xff]  ;;  %s716_s30 = sshll.u32 %s933_s2, 4  ;;  %s934_s4 = smov [#allocation8]   ;;  %s717_s30 = int_to_ptr.vmem [resolvable:$true] %s716_s30 }
  0x13   :  { %v90_v11 = vmul.f32 0.17677669, %v66_v9  ;;  %v92_v12 = vmul.f32 0.17677669, %v68_v10  ;;  %v80_v13 = vld [vmem:[#allocation5 + $0x38] sm:$0xff]  ;;  %738 = vmatmul.msk.f32.vlgmr.msra.gmra.mxu0 %vm97_vm0, %v89_v3  ;;  %742 = vmatmul.msk.f32.vlgmr.msra.gmra.mxu2 %vm97_vm0, %v91_v7  ;;  %v78_v14 = vld [vmem:[#allocation5 + $0x28] sm:$0xff] }
  0x14   :  { %749 = vmatpush.xpose.msk.msrb.mxu2 %vm97_vm0, %v79_v5  ;;  %v77_v16 = vld [vmem:[#allocation5 + $0x20] sm:$0xff]  ;;  %v70_v18 = vld [vmem:[#allocation2 + $0x28] sm:$0xff]  ;;  %v72_v19 = vld [vmem:[#allocation2 + $0x38] sm:$0xff]  ;;  %v95_v20 = vmul.f32 0.17677669, %v71_v15  ;;  %s703_s8 = sshll.u32 %s934_s4, 4  ;;  %s704_s8 = int_to_ptr.vmem [resolvable:$true] %s703_s8 }
  0x15   :  { %740 = vmatmul.msk.f32.vlgmr.msra.gmra.mxu1 %vm97_vm0, %v90_v11  ;;  %v69_v17 = vld [vmem:[#allocation2 + $0x20] sm:$0xff]  ;;  %744 = vmatmul.msk.f32.vlgmr.msra.gmra.mxu3 %vm97_vm0, %v92_v12  ;;  %v94_v22 = vmul.f32 0.17677669, %v70_v18  ;;  %v96_v23 = vmul.f32 0.17677669, %v72_v19  ;;  %s705_s11 = sshll.u32 %s1140_s3, 4  ;;  %s706_s11 = int_to_ptr.hbm [resolvable:$true] %s705_s11 }
  0x16   :  { %751 = vmatpush.xpose.msk.msrb.mxu3 %vm97_vm0, %v80_v13  ;;  %747 = vmatpush.xpose.msk.msrb.mxu1 %vm97_vm0, %v78_v14  ;;  %v93_v21 = vmul.f32 0.17677669, %v69_v17  ;;  %v83_v17 = vld [vmem:[#allocation7 + $0x10] sm:$0xff] }
  0x17   :  { %745 = vmatpush.xpose.msk.msrb.mxu0 %vm97_vm0, %v77_v16  ;;  %v81_v16 = vld [vmem:[#allocation7] sm:$0xff] }
  0x18   :  { %571 = vmatpush.msra.mxu2 %v83_v17 }
  0x1b   :  { %750 = vmatmul.msk.f32.vlgmr.msrb.gmra.mxu2 %vm97_vm0, %v95_v20  ;;  %746 = vmatmul.msk.f32.vlgmr.msrb.gmra.mxu0 %vm97_vm0, %v93_v21  ;;  %v84_v20 = vld [vmem:[#allocation7 + $0x18] sm:$0xff]  ;;  %v82_v21 = vld [vmem:[#allocation7 + $0x8] sm:$0xff] }
  0x1c   :  { %525 = vmatpush.msra.mxu0 %v81_v16  ;;  %594 = vmatpush.msra.mxu3 %v84_v20 }
  0x1d   :  { %748 = vmatmul.msk.f32.vlgmr.msrb.gmra.mxu1 %vm97_vm0, %v94_v22  ;;  %752 = vmatmul.msk.f32.vlgmr.msrb.gmra.mxu3 %vm97_vm0, %v96_v23 }
  0x1e   :  { %548 = vmatpush.msra.mxu1 %v82_v21 }
  0x90   :  { %v121_v24 = vpop.f32.mrf.mxu0 }
  0x91   :  { %v307_v25 = vsel %vm306_vm1, %v121_v24, -inf }
  0x92   :  { %308 = vmax.xlane.f32.xlu1 %v307_v25  ;;  %v147_v26 = vpop.f32.mrf.mxu1 }
  0x93   :  { %v310_v29 = vsel %vm306_vm1, %v147_v26, -inf }
  0x96   :  { %v173_v27 = vpop.f32.mrf.mxu2 }
  0x97   :  { %v313_v28 = vsel %vm306_vm1, %v173_v27, -inf }
  0x98   :  { %314 = vmax.xlane.f32.xlu0 %v313_v28  ;;  %v199_v30 = vpop.f32.mrf.mxu3  ;;  %v225_v36 = vpop.f32.mrf.mxu0 }
  0x99   :  { %v316_v32 = vsel %vm306_vm1, %v199_v30, -inf  ;;  %v319_v39 = vsel %vm306_vm1, %v225_v36, -inf }
  0x9a   :  { %311 = vmax.xlane.f32.xlu1 %v310_v29  ;;  %v251_v31 = vpop.f32.mrf.mxu1 }
  0x9b   :  { %v322_v35 = vsel %vm306_vm1, %v251_v31, -inf }
  0x9e   :  { %v277_v33 = vpop.f32.mrf.mxu2 }
  0x9f   :  { %v325_v34 = vsel %vm306_vm1, %v277_v33, -inf }
  0xa0   :  { %317 = vmax.xlane.f32.xlu0 %v316_v32  ;;  %326 = vmax.xlane.f32.xlu2 %v325_v34  ;;  %v303_v37 = vpop.f32.mrf.mxu3  ;;  %v88_v34 = vld [vmem:[#allocation7 + $0x38] sm:$0xff] }
  0xa1   :  { %v328_v38 = vsel %vm306_vm1, %v303_v37, -inf  ;;  %686 = vmatpush.msrb.mxu3 %v88_v34 }
  0xa2   :  { %323 = vmax.xlane.f32.xlu1 %v322_v35  ;;  %v85_v35 = vld [vmem:[#allocation7 + $0x20] sm:$0xff] }
  0xa3   :  { %617 = vmatpush.msrb.mxu0 %v85_v35 }
  0xa8   :  { %329 = vmax.xlane.f32.xlu2 %v328_v38  ;;  %320 = vmax.xlane.f32.xlu0 %v319_v39 }
 0x105   :  { %v309_v40 = vpop.xlane.xlu1 %308 }
 0x106   :  { %v331_v41 = vsub.f32 %v121_v24, %v309_v40 }
 0x108   :  { %v339_v42 = vmul.f32 1.442695, %v331_v41 }
 0x10a   :  { %768 = vpow2.f32 %v339_v42  ;;  %v86_v42 = vld [vmem:[#allocation7 + $0x28] sm:$0xff] }
 0x10b   :  { %v315_v43 = vpop.xlane.xlu0 %314  ;;  %640 = vmatpush.msrb.mxu1 %v86_v42 }
 0x10c   :  { %v333_v44 = vsub.f32 %v173_v27, %v315_v43 }
 0x10d   :  { %v312_v45 = vpop.xlane.xlu1 %311 }
 0x10e   :  { %v343_v46 = vmul.f32 1.442695, %v333_v44  ;;  %v332_v47 = vsub.f32 %v147_v26, %v312_v45 }
 0x110   :  { %v1002_v48 = vpop.eup %768  ;;  %770 = vpow2.f32 %v343_v46  ;;  %v341_v50 = vmul.f32 1.442695, %v332_v47 }
 0x111   :  { %v355_v49 = vsel %vm306_vm1, %v1002_v48, 0.0 }
 0x112   :  { %356 = vadd.xlane.f32.xlu1 %v355_v49  ;;  %772 = vpow2.f32 %v341_v50 }
 0x113   :  { %v318_v51 = vpop.xlane.xlu0 %317  ;;  %v327_v52 = vpop.xlane.xlu2 %326 }
 0x114   :  { %v334_v53 = vsub.f32 %v199_v30, %v318_v51  ;;  %v337_v56 = vsub.f32 %v277_v33, %v327_v52  ;;  %v87_v33 = vld [vmem:[#allocation7 + $0x30] sm:$0xff] }
 0x115   :  { %v324_v59 = vpop.xlane.xlu1 %323  ;;  %663 = vmatpush.msrb.mxu2 %v87_v33 }
 0x116   :  { %v1006_v54 = vpop.eup %770  ;;  %v345_v55 = vmul.f32 1.442695, %v334_v53  ;;  %v351_v58 = vmul.f32 1.442695, %v337_v56  ;;  %v336_v2 = vsub.f32 %v251_v31, %v324_v59 }
 0x117   :  { %v361_v57 = vsel %vm306_vm1, %v1006_v54, 0.0 }
 0x118   :  { %774 = vpow2.f32 %v345_v55  ;;  %362 = vadd.xlane.f32.xlu2 %v361_v57  ;;  %v1010_v62 = vpop.eup %772  ;;  %v349_v7 = vmul.f32 1.442695, %v336_v2 }
 0x119   :  { %776 = vpow2.f32 %v351_v58  ;;  %v358_v5 = vsel %vm306_vm1, %v1010_v62, 0.0 }
 0x11b   :  { %v330_v60 = vpop.xlane.xlu2 %329  ;;  %v321_v61 = vpop.xlane.xlu0 %320 }
 0x11c   :  { %v338_v63 = vsub.f32 %v303_v37, %v330_v60  ;;  %v335_v0 = vsub.f32 %v225_v36, %v321_v61 }
 0x11e   :  { %v1012_v1 = vpop.eup %774  ;;  %v353_v3 = vmul.f32 1.442695, %v338_v63  ;;  %v347_v4 = vmul.f32 1.442695, %v335_v0 }
 0x11f   :  { %v364_v6 = vsel %vm306_vm1, %v1012_v1, 0.0  ;;  %v1018_v8 = vpop.eup %776 }
 0x120   :  { %778 = vpow2.f32 %v353_v3  ;;  %359 = vadd.xlane.f32.xlu2 %v358_v5  ;;  %365 = vadd.xlane.f32.xlu0 %v364_v6  ;;  %v373_v12 = vsel %vm306_vm1, %v1018_v8, 0.0 }
 0x121   :  { %780 = vpow2.f32 %v347_v4 }
 0x122   :  { %782 = vpow2.f32 %v349_v7 }
 0x126   :  { %v1020_v9 = vpop.eup %778 }
 0x127   :  { %v1022_v10 = vpop.eup %780  ;;  %v376_v11 = vsel %vm306_vm1, %v1020_v9, 0.0 }
 0x128   :  { %377 = vadd.xlane.f32.xlu1 %v376_v11  ;;  %374 = vadd.xlane.f32.xlu0 %v373_v12  ;;  %v367_v13 = vsel %vm306_vm1, %v1022_v10, 0.0  ;;  %v1030_v14 = vpop.eup %782 }
 0x129   :  { %368 = vadd.xlane.f32.xlu2 %v367_v13  ;;  %v370_v15 = vsel %vm306_vm1, %v1030_v14, 0.0 }
 0x130   :  { %371 = vadd.xlane.f32.xlu0 %v370_v15 }
 0x185   :  { %v357_v18 = vpop.xlane.xlu1 %356 }
 0x186   :  { %784 = vrcp.f32 %v357_v18  ;;  %v390_v25 = vand.u32 2147483648, %v357_v18  ;;  %v388_v27 = vand.u32 2147483647, %v357_v18  ;;  %vm384_vm3 = vweird.f32 %v357_v18 }
 0x188   :  { %v391_v36 = vor.u32 1.1754944e-38, %v390_v25  ;;  %vm389_vm5 = vcmp.eq.f32.partialorder %v388_v27, 8.507059e+37 }
 0x18b   :  { %v363_v19 = vpop.xlane.xlu2 %362 }
 0x18c   :  { %v785_v22 = vpop.eup %784  ;;  %786 = vrcp.f32 %v363_v19  ;;  %v416_v44 = vand.u32 2147483647, %v363_v19  ;;  %v418_v45 = vand.u32 2147483648, %v363_v19  ;;  %vm412_vm7 = vweird.f32 %v363_v19 }
 0x18d   :  { %v380_v23 = vmul.f32 %v785_v22, %v357_v18  ;;  %vm385_vm2 = vweird.f32 %v785_v22 }
 0x18e   :  { %vm386_vm4 = vmor %vm384_vm3, %vm385_vm2  ;;  %vm417_vm9 = vcmp.eq.f32.partialorder %v416_v44, 8.507059e+37  ;;  %v419_v56 = vor.u32 1.1754944e-38, %v418_v45 }
 0x18f   :  { %v381_v24 = vsub.f32 1.0, %v380_v23 }
 0x191   :  { %v382_v26 = vmul.f32 %v785_v22, %v381_v24 }
 0x192   :  { %v787_v28 = vpop.eup %786 }
 0x193   :  { %v383_v29 = vadd.f32 %v785_v22, %v382_v26  ;;  %v408_v30 = vmul.f32 %v787_v28, %v363_v19  ;;  %v360_v31 = vpop.xlane.xlu2 %359  ;;  %v1034_v32 = vpop.xlane.xlu0 %365  ;;  %vm413_vm6 = vweird.f32 %v787_v28 }
 0x194   :  { %788 = vrcp.f32 %v360_v31  ;;  %vm1040_vm8 = vmor %vm412_vm7, %vm413_vm6  ;;  %v402_v58 = vand.u32 2147483647, %v360_v31  ;;  %v404_v59 = vand.u32 2147483648, %v360_v31  ;;  %v430_v61 = vand.u32 2147483647, %v1034_v32 }
 0x195   :  { %v387_v37 = vsel %vm386_vm4, %v785_v22, %v383_v29  ;;  %v409_v38 = vsub.f32 1.0, %v408_v30  ;;  %790 = vrcp.f32 %v1034_v32  ;;  %v432_v2 = vand.u32 2147483648, %v1034_v32 }
 0x196   :  { %v392_v39 = vsel %vm389_vm5, %v391_v36, %v387_v37  ;;  %vm398_vm12 = vweird.f32 %v360_v31  ;;  %vm426_vm13 = vweird.f32 %v1034_v32  ;;  %vm403_vm15 = vcmp.eq.f32.partialorder %v402_v58, 8.507059e+37 }
 0x197   :  { %v410_v40 = vmul.f32 %v787_v28, %v409_v38  ;;  %v491_v41 = vmul.f32 %v1002_v48, %v392_v39  ;;  %v405_v6 = vor.u32 1.1754944e-38, %v404_v59  ;;  %vm431_vm3 = vcmp.eq.f32.partialorder %v430_v61, 8.507059e+37 }
 0x198   :  { %v433_v13 = vor.u32 1.1754944e-38, %v432_v2 }
 0x199   :  { %v411_v43 = vadd.f32 %v787_v28, %v410_v40  ;;  %499 = vst.msk [vmem:[#allocation9] sm:$0xff] %vm306_vm1, %v491_v41  ;;  %753 = vmatmul.msk.f32.vlgmr.msra.gmra.mxu0 %vm306_vm1, %v491_v41 }
 0x19a   :  { %v789_v46 = vpop.eup %788 }
 0x19b   :  { %v791_v47 = vpop.eup %790  ;;  %v394_v50 = vmul.f32 %v789_v46, %v360_v31  ;;  %v1044_v51 = vpop.xlane.xlu1 %377  ;;  %v415_v52 = vsel %vm1040_vm8, %v787_v28, %v411_v43  ;;  %vm399_vm10 = vweird.f32 %v789_v46 }
 0x19c   :  { %v1046_v48 = vpop.xlane.xlu0 %374  ;;  %v422_v53 = vmul.f32 %v791_v47, %v1034_v32  ;;  %792 = vrcp.f32 %v1044_v51  ;;  %v1052_v55 = vpop.xlane.xlu2 %368  ;;  %v420_v63 = vsel %vm417_vm9, %v419_v56, %v415_v52  ;;  %vm427_vm11 = vweird.f32 %v791_v47  ;;  %vm400_vm14 = vmor %vm398_vm12, %vm399_vm10 }
 0x19d   :  { %v395_v57 = vsub.f32 1.0, %v394_v50  ;;  %794 = vrcp.f32 %v1052_v55  ;;  %v493_v11 = vmul.f32 %v1006_v54, %v420_v63  ;;  %vm428_vm2 = vmor %vm426_vm13, %vm427_vm11  ;;  %v486_v20 = vand.u32 2147483647, %v1044_v51 }
 0x19e   :  { %v423_v60 = vsub.f32 1.0, %v422_v53  ;;  %796 = vrcp.f32 %v1046_v48  ;;  %vm482_vm4 = vweird.f32 %v1044_v51  ;;  %v488_v24 = vand.u32 2147483648, %v1044_v51 }
 0x19f   :  { %v396_v0 = vmul.f32 %v789_v46, %v395_v57  ;;  %501 = vst.msk [vmem:[#allocation9 + $0x10] sm:$0xff] %vm306_vm1, %v493_v11  ;;  %755 = vmatmul.msk.f32.vlgmr.msra.gmra.mxu2 %vm306_vm1, %v493_v11  ;;  %vm440_vm5 = vweird.f32 %v1052_v55  ;;  %v444_v25 = vand.u32 2147483647, %v1052_v55  ;;  %vm1074_vm7 = vcmp.eq.f32.partialorder %v486_v20, 8.507059e+37 }
 0x1a0   :  { %v424_v3 = vmul.f32 %v791_v47, %v423_v60  ;;  %v446_v31 = vand.u32 2147483648, %v1052_v55  ;;  %v472_v32 = vand.u32 2147483647, %v1046_v48  ;;  %v489_v37 = vor.u32 1.1754944e-38, %v488_v24 }
 0x1a1   :  { %v397_v4 = vadd.f32 %v789_v46, %v396_v0  ;;  %vm1085_vm10 = vcmp.eq.f32.partialorder %v444_v25, 8.507059e+37  ;;  %v474_v39 = vand.u32 2147483648, %v1046_v48  ;;  %vm468_vm13 = vweird.f32 %v1046_v48 }
 0x1a2   :  { %v793_v5 = vpop.eup %792  ;;  %v425_v7 = vadd.f32 %v791_v47, %v424_v3  ;;  %v447_v44 = vor.u32 1.1754944e-38, %v446_v31 }
 0x1a3   :  { %v401_v12 = vsel %vm400_vm14, %v789_v46, %v397_v4  ;;  %v478_v15 = vmul.f32 %v793_v5, %v1044_v51  ;;  %v795_v17 = vpop.eup %794  ;;  %vm483_vm6 = vweird.f32 %v793_v5  ;;  %vm473_vm14 = vcmp.eq.f32.partialorder %v472_v32, 8.507059e+37 }
 0x1a4   :  { %v1061_v16 = vpop.xlane.xlu0 %371  ;;  %v406_v18 = vsel %vm403_vm15, %v405_v6, %v401_v12  ;;  %v429_v19 = vsel %vm428_vm2, %v791_v47, %v425_v7  ;;  %v436_v22 = vmul.f32 %v795_v17, %v1052_v55  ;;  %v797_v23 = vpop.eup %796  ;;  %vm441_vm8 = vweird.f32 %v795_v17  ;;  %vm484_vm9 = vmor %vm482_vm4, %vm483_vm6 }
 0x1a5   :  { %798 = vrcp.f32 %v1061_v16  ;;  %v434_v54 = vsel %vm431_vm3, %v433_v13, %v429_v19  ;;  %v479_v21 = vsub.f32 1.0, %v478_v15  ;;  %v492_v26 = vmul.f32 %v1010_v62, %v406_v18  ;;  %vm442_vm12 = vmor %vm440_vm5, %vm441_vm8 }
 0x1a6   :  { %v437_v28 = vsub.f32 1.0, %v436_v22  ;;  %v464_v29 = vmul.f32 %v797_v23, %v1046_v48  ;;  %v494_v33 = vmul.f32 %v1012_v1, %v434_v54  ;;  %vm469_vm11 = vweird.f32 %v797_v23 }
 0x1a7   :  { %v480_v27 = vmul.f32 %v793_v5, %v479_v21  ;;  %500 = vst.msk [vmem:[#allocation9 + $0x8] sm:$0xff] %vm306_vm1, %v492_v26  ;;  %754 = vmatmul.msk.f32.vlgmr.msra.gmra.mxu1 %vm306_vm1, %v492_v26  ;;  %vm470_vm15 = vmor %vm468_vm13, %vm469_vm11  ;;  %v475_v51 = vor.u32 1.1754944e-38, %v474_v39  ;;  %v458_v52 = vand.u32 2147483647, %v1061_v16  ;;  %v460_v53 = vand.u32 2147483648, %v1061_v16 }
 0x1a8   :  { %v438_v34 = vmul.f32 %v795_v17, %v437_v28  ;;  %v465_v35 = vsub.f32 1.0, %v464_v29  ;;  %502 = vst.msk [vmem:[#allocation9 + $0x18] sm:$0xff] %vm306_vm1, %v494_v33  ;;  %756 = vmatmul.msk.f32.vlgmr.msra.gmra.mxu3 %vm306_vm1, %v494_v33  ;;  %vm454_vm3 = vweird.f32 %v1061_v16 }
 0x1a9   :  { %v481_v62 = vadd.f32 %v793_v5, %v480_v27  ;;  %v461_v59 = vor.u32 1.1754944e-38, %v460_v53  ;;  %vm459_vm5 = vcmp.eq.f32.partialorder %v458_v52, 8.507059e+37 }
 0x1aa   :  { %v439_v40 = vadd.f32 %v795_v17, %v438_v34  ;;  %v466_v41 = vmul.f32 %v797_v23, %v465_v35 }
 0x1ab   :  { %v799_v36 = vpop.eup %798  ;;  %v485_v1 = vsel %vm484_vm9, %v793_v5, %v481_v62 }
 0x1ac   :  { %v450_v42 = vmul.f32 %v799_v36, %v1061_v16  ;;  %v490_v43 = vsel %vm1074_vm7, %v489_v37, %v485_v1  ;;  %v443_v46 = vsel %vm442_vm12, %v795_v17, %v439_v40  ;;  %v467_v47 = vadd.f32 %v797_v23, %v466_v41 }
 0x1ad   :  { %v498_v45 = vmul.f32 %v1020_v9, %v490_v43  ;;  %v448_v50 = vsel %vm1085_vm10, %v447_v44, %v443_v46  ;;  %vm455_vm2 = vweird.f32 %v799_v36 }
 0x1ae   :  { %v451_v49 = vsub.f32 1.0, %v450_v42  ;;  %v495_v48 = vmul.f32 %v1022_v10, %v448_v50  ;;  %v471_v55 = vsel %vm470_vm15, %v797_v23, %v467_v47  ;;  %vm456_vm4 = vmor %vm454_vm3, %vm455_vm2 }
 0x1af   :  { %506 = vst.msk [vmem:[#allocation9 + $0x38] sm:$0xff] %vm306_vm1, %v498_v45  ;;  %v476_v9 = vsel %vm473_vm14, %v475_v51, %v471_v55 }
 0x1b0   :  { %v452_v56 = vmul.f32 %v799_v36, %v451_v49  ;;  %503 = vst.msk [vmem:[#allocation9 + $0x20] sm:$0xff] %vm306_vm1, %v495_v48  ;;  %757 = vmatmul.msk.f32.vlgmr.msrb.gmra.mxu0 %vm306_vm1, %v495_v48  ;;  %v497_v58 = vmul.f32 %v1018_v8, %v476_v9  ;;  %760 = vmatmul.msk.f32.vlgmr.msrb.gmra.mxu3 %vm306_vm1, %v498_v45 }
 0x1b2   :  { %v453_v57 = vadd.f32 %v799_v36, %v452_v56  ;;  %505 = vst.msk [vmem:[#allocation9 + $0x30] sm:$0xff] %vm306_vm1, %v497_v58  ;;  %759 = vmatmul.msk.f32.vlgmr.msrb.gmra.mxu2 %vm306_vm1, %v497_v58 }
 0x1b4   :  { %v457_v60 = vsel %vm456_vm4, %v799_v36, %v453_v57 }
 0x1b5   :  { %v462_v10 = vsel %vm459_vm5, %v461_v59, %v457_v60 }
 0x1b6   :  { %v496_v61 = vmul.f32 %v1030_v14, %v462_v10 }
 0x1b8   :  { %504 = vst.msk [vmem:[#allocation9 + $0x28] sm:$0xff] %vm306_vm1, %v496_v61  ;;  %758 = vmatmul.msk.f32.vlgmr.msrb.gmra.mxu1 %vm306_vm1, %v496_v61 }
 0x1b9   :  { %724 = dma.vmem_to_hbm [thread:$0]  %s717_s30, 1024, %s719_s7, [#allocation10], %s929_s23, %s929_s23, %s930_s24  }
 0x216   :  { %v527_v8 = vpop.f32.mrf.mxu0 }
 0x217   :  { %691 = vst.msk [vmem:[#allocation8] sm:$0xff] %vm97_vm0, %v527_v8 }
 0x222   :  { %v573_v63 = vpop.f32.mrf.mxu2 }
 0x223   :  { %693 = vst.msk [vmem:[#allocation8 + $0x10] sm:$0xff] %vm97_vm0, %v573_v63 }
 0x224   :  { %v550_v14 = vpop.f32.mrf.mxu1 }
 0x225   :  { %692 = vst.msk [vmem:[#allocation8 + $0x8] sm:$0xff] %vm97_vm0, %v550_v14 }
 0x22b   :  { %v596_v0 = vpop.f32.mrf.mxu3 }
 0x22c   :  { %694 = vst.msk [vmem:[#allocation8 + $0x18] sm:$0xff] %vm97_vm0, %v596_v0 }
 0x22d   :  { %v619_v2 = vpop.f32.mrf.mxu0 }
 0x22e   :  { %695 = vst.msk [vmem:[#allocation8 + $0x20] sm:$0xff] %vm97_vm0, %v619_v2 }
 0x233   :  { %v688_v4 = vpop.f32.mrf.mxu3 }
 0x234   :  { %698 = vst.msk [vmem:[#allocation8 + $0x38] sm:$0xff] %vm97_vm0, %v688_v4 }
 0x235   :  { %v642_v3 = vpop.f32.mrf.mxu1  ;;  %v665_v5 = vpop.f32.mrf.mxu2 }
 0x236   :  { %696 = vst.msk [vmem:[#allocation8 + $0x28] sm:$0xff] %vm97_vm0, %v642_v3 }
 0x237   :  { %697 = vst.msk [vmem:[#allocation8 + $0x30] sm:$0xff] %vm97_vm0, %v665_v5 }
 0x238   :  { %711 = dma.vmem_to_hbm [thread:$0]  %s704_s8, 1024, %s706_s11, [#allocation4], %s929_s23, %s929_s23, %s930_s24  }
 0x239   :  { %924 = dma.done.wait [#allocation4], 1024  }
 0x23a   :  { %925 = vsyncadd [#allocation4], 4294966272 }
 0x23b   :  { %926 = dma.done.wait [#allocation10], 1024  }
 0x23c   :  { %927 = vsyncadd [#allocation10], 4294966272 }
 0x23d   :  { %733 = vsyncpa [#allocation3], 1 }
 0x23e   :  { %734 = vsyncpa [#allocation6], 1 }
 0x23f   :  { %735 = vsyncpa [#allocation4], 1 }
 0x240   :  { %736 = vsyncpa [#allocation10], 1 }

</bundles_post_ra>
